<compile_context>
chip_gen: v5e
topology: v5e:2x2
jax: 0.10.0
libtpu: 0.0.40
codegen_flags: <defaults>
</compile_context>

<pallas_src>
import jax
import jax.numpy as jnp
from jax import lax
from jax.experimental import pallas as pl
from jax.experimental.pallas import tpu as pltpu

INPUT_DIM = 42
HIDDEN_DIM = 10


def _lstm_kernel(x_ref, hc0_ref, w_ref, out_ref, gx_ref):
    """Single-layer LSTM forward over the full sequence (one invocation).

    x_ref:   (T*B, Dp)     f32  time-major rows (row t*B + b = x[t, b]),
                                contraction dim zero-padded to Dp.
    hc0_ref: (2, B, H)     f32  row 0 = h0, row 1 = c0.
    w_ref:   (Dp+H+1, 4H)  f32  rows [0:Dp]      = W_ih^T (padded),
                                rows [Dp:Dp+H]   = W_hh^T,
                                row  [Dp+H]      = b_ih + b_hh,
                                gate column order (i, f, o, g).
    out_ref: (T+1, B, H)   f32  rows 0..T-1 = per-step h, row T = c_n.
    gx_ref:  (T*B, 4H)     f32  VMEM scratch for the hoisted input projection.
    """
    H = w_ref.shape[1] // 4
    Dp = w_ref.shape[0] - H - 1
    T = out_ref.shape[0] - 1
    B = out_ref.shape[1]

    # Hoist loop-invariant loads once (Mosaic will not reliably LICM them).
    wih = w_ref[0:Dp, :]                 # (Dp, 4H)
    whh = w_ref[Dp:Dp + H, :]            # (H, 4H)
    b = w_ref[Dp + H:Dp + H + 1, :]      # (1, 4H)

    # Hoisted input projection: ONE MXU matmul + ONE bias add covers every
    # timestep; only the tiny h @ W_hh stays on the sequential path.  Stage in
    # VMEM scratch so per-step access is a plain vector load.
    gx_ref[...] = jnp.dot(x_ref[...], wih,
                          preferred_element_type=jnp.float32) + b   # (T*B, 4H)

    h = hc0_ref[0]                                                  # (B, H)
    c = hc0_ref[1]                                                  # (B, H)

    # T is small and static -> fully unroll the recurrence.
    for t in range(T):
        gx_t = gx_ref[pl.ds(t * B, B), :]                           # (B, 4H)
        gates = gx_t + jnp.dot(h, whh,
                               preferred_element_type=jnp.float32)  # (B, 4H)
        # Activate the FULL (B, 4H) vreg (per-vreg EUP cost, lanes < 128 are
        # free), then extract gate columns AFTER the activations so the EUP
        # pushes are not gated on XLU lane extracts.
        sig = jax.nn.sigmoid(gates)                                 # (B, 4H)
        tnh = jnp.tanh(gates)                                       # (B, 4H)
        i_g = sig[:, 0 * H:1 * H]
        f_g = sig[:, 1 * H:2 * H]
        o_g = sig[:, 2 * H:3 * H]
        g_g = tnh[:, 3 * H:4 * H]
        c = f_g * c + i_g * g_g
        h = o_g * jnp.tanh(c)
        out_ref[t] = h

    out_ref[T] = c


def encoder_rnn_forward(x, h0, c0, w_ih, w_hh, b_ih, b_hh):
    """Mirrors EncoderRNN.forward: returns (output, (h_n, c_n)).

    x:        (T, B, D) seq-major (PyTorch batch_first=False)
    h0, c0:   (1, B, H)
    w_ih:     (4H, D), w_hh: (4H, H), b_ih/b_hh: (4H,)  — PyTorch (i,f,g,o) rows
    """
    T, B, D = x.shape
    H = w_hh.shape[1]
    Dp = ((D + 7) // 8) * 8   # sublane-align the contraction dim (42 -> 48)

    def reorder_gates(w):
        # PyTorch row blocks (i, f, g, o) -> kernel order (i, f, o, g).
        return jnp.concatenate(
            [w[0 * H:1 * H], w[1 * H:2 * H], w[3 * H:4 * H], w[2 * H:3 * H]],
            axis=0)

    wih_t = jnp.asarray(reorder_gates(w_ih), jnp.float32).T          # (D, 4H)
    wih_t = jnp.pad(wih_t, ((0, Dp - D), (0, 0)))                    # (Dp, 4H)
    whh_t = jnp.asarray(reorder_gates(w_hh), jnp.float32).T          # (H, 4H)
    bias = jnp.asarray(reorder_gates(b_ih + b_hh),
                       jnp.float32).reshape(1, 4 * H)                # (1, 4H)
    # Single fused parameter buffer -> one DMA instead of three.
    w_all = jnp.concatenate([wih_t, whh_t, bias], axis=0)            # (Dp+H+1, 4H)

    # Row-major contiguous reshape (free), then exact zero-pad of K dim.
    x2d = jnp.asarray(x, jnp.float32).reshape(T * B, D)
    x2d = jnp.pad(x2d, ((0, 0), (0, Dp - D)))                        # (T*B, Dp)

    # Single fused state buffer: row 0 = h0, row 1 = c0.
    hc0 = jnp.concatenate([jnp.asarray(h0, jnp.float32),
                           jnp.asarray(c0, jnp.float32)], axis=0)    # (2, B, H)

    vmem = lambda: pl.BlockSpec(memory_space=pltpu.MemorySpace.VMEM)

    itemsize = 4
    bytes_accessed = itemsize * (x2d.size + hc0.size + w_all.size
                                 + (T + 1) * B * H)
    cost = pl.CostEstimate(
        flops=2 * T * B * (Dp + H) * 4 * H,
        transcendentals=T * B * (2 * 4 * H + H),
        bytes_accessed=bytes_accessed,
    )

    out_full = pl.pallas_call(
        _lstm_kernel,
        out_shape=jax.ShapeDtypeStruct((T + 1, B, H), jnp.float32),
        in_specs=[vmem(), vmem(), vmem()],
        out_specs=vmem(),
        scratch_shapes=[pltpu.VMEM((T * B, 4 * H), jnp.float32)],
        cost_estimate=cost,
    )(x2d, hc0, w_all)

    out = out_full[:T]              # (T, B, H)
    hn = out_full[T - 1][None]      # (1, B, H)  == last hidden
    cn = out_full[T][None]          # (1, B, H)
    return out, (hn, cn)


def lstm_reference(x, h0, c0, w_ih, w_hh, b_ih, b_hh):
    """Pure-JAX reference (PyTorch nn.LSTM semantics, 1 layer, (i,f,g,o))."""
    H = w_hh.shape[1]

    def step(carry, x_t):
        h, c = carry
        gates = x_t @ w_ih.T + h @ w_hh.T + b_ih + b_hh
        i = jax.nn.sigmoid(gates[:, 0 * H:1 * H])
        f = jax.nn.sigmoid(gates[:, 1 * H:2 * H])
        g = jnp.tanh(gates[:, 2 * H:3 * H])
        o = jax.nn.sigmoid(gates[:, 3 * H:4 * H])
        c = f * c + i * g
        h = o * jnp.tanh(c)
        return (h, c), h

    (hn, cn), ys = lax.scan(step, (h0[0], c0[0]), x)
    return ys, (hn[None], cn[None])


if __name__ == "__main__":
    T, B, D, H = 8, 2, INPUT_DIM, HIDDEN_DIM

    key = jax.random.PRNGKey(0)
    k_x, k_h, k_c, k_wi, k_wh, k_bi, k_bh = jax.random.split(key, 7)

    # Deterministic parameter init (PyTorch uses U(-1/sqrt(H), 1/sqrt(H))).
    bound = 1.0 / (H ** 0.5)
    w_ih = jax.random.uniform(k_wi, (4 * H, D), jnp.float32, -bound, bound)
    w_hh = jax.random.uniform(k_wh, (4 * H, H), jnp.float32, -bound, bound)
    b_ih = jax.random.uniform(k_bi, (4 * H,), jnp.float32, -bound, bound)
    b_hh = jax.random.uniform(k_bh, (4 * H,), jnp.float32, -bound, bound)

    x = jax.random.normal(k_x, (T, B, D), jnp.float32)
    h0 = jax.random.normal(k_h, (1, B, H), jnp.float32)
    c0 = jax.random.normal(k_c, (1, B, H), jnp.float32)

    out, (hn, cn) = encoder_rnn_forward(x, h0, c0, w_ih, w_hh, b_ih, b_hh)
    jax.block_until_ready((out, hn, cn))

    # Correctness check against pure-JAX reference (f32 everywhere).
    out_r, (hn_r, cn_r) = lstm_reference(x, h0, c0, w_ih, w_hh, b_ih, b_hh)
    assert jnp.allclose(out, out_r, atol=1e-5, rtol=1e-5)
    assert jnp.allclose(hn, hn_r, atol=1e-5, rtol=1e-5)
    assert jnp.allclose(cn, cn_r, atol=1e-5, rtol=1e-5)

    print("KERNEL_OK")
</pallas_src>

<mosaic_0001>
module attributes {stable_mosaic.version = 11 : i64} {
  func.func @_lstm_kernel(%arg0: memref<16x48xf32, #tpu.memory_space<vmem>>, %arg1: memref<2x2x10xf32, #tpu.memory_space<vmem>>, %arg2: memref<59x40xf32, #tpu.memory_space<vmem>>, %arg3: memref<9x2x10xf32, #tpu.memory_space<vmem>>, %arg4: memref<16x40xf32, #tpu.memory_space<vmem>>) attributes {dimension_semantics = [], scalar_prefetch = 0 : i64, scratch_operands = 1 : i64, tpu.core_type = #tpu.core_type<tc>} {
    %c0 = arith.constant 0 : index
    %c0_0 = arith.constant 0 : index
    %0 = vector.load %arg2[%c0, %c0_0] : memref<59x40xf32, #tpu.memory_space<vmem>>, vector<48x40xf32>
    %c48 = arith.constant 48 : index
    %c0_1 = arith.constant 0 : index
    %1 = vector.load %arg2[%c48, %c0_1] : memref<59x40xf32, #tpu.memory_space<vmem>>, vector<10x40xf32>
    %c58 = arith.constant 58 : index
    %c0_2 = arith.constant 0 : index
    %2 = vector.load %arg2[%c58, %c0_2] : memref<59x40xf32, #tpu.memory_space<vmem>>, vector<1x40xf32>
    %c0_3 = arith.constant 0 : index
    %c0_4 = arith.constant 0 : index
    %3 = vector.load %arg0[%c0_3, %c0_4] : memref<16x48xf32, #tpu.memory_space<vmem>>, vector<16x48xf32>
    %cst = arith.constant dense<0.000000e+00> : vector<16x40xf32>
    %4 = tpu.matmul %3, %0, %cst {dimension_numbers = #tpu.dot_dimension_numbers<[1], [0], [0], [1], [0, 0, 1, 1], [], []>} : vector<16x48xf32>, vector<48x40xf32>, vector<16x40xf32> -> vector<16x40xf32>
    %5 = vector.broadcast %2 : vector<1x40xf32> to vector<16x40xf32>
    %6 = arith.addf %4, %5 : vector<16x40xf32>
    %c0_5 = arith.constant 0 : index
    %c0_6 = arith.constant 0 : index
    %7 = vector.load %arg4[%c0_5, %c0_6] : memref<16x40xf32, #tpu.memory_space<vmem>>, vector<16x40xf32>
    tpu.vector_store %arg4[%c0_5, %c0_6], %6 {strides = array<i32>} : memref<16x40xf32, #tpu.memory_space<vmem>>, vector<16x40xf32>,
    %c0_7 = arith.constant 0 : index
    %c0_8 = arith.constant 0 : index
    %c0_9 = arith.constant 0 : index
    %8 = vector.load %arg1[%c0_7, %c0_8, %c0_9] : memref<2x2x10xf32, #tpu.memory_space<vmem>>, vector<1x2x10xf32>
    %9 = vector.shape_cast %8 : vector<1x2x10xf32> to vector<2x10xf32>
    %c1 = arith.constant 1 : index
    %c0_10 = arith.constant 0 : index
    %c0_11 = arith.constant 0 : index
    %10 = vector.load %arg1[%c1, %c0_10, %c0_11] : memref<2x2x10xf32, #tpu.memory_space<vmem>>, vector<1x2x10xf32>
    %11 = vector.shape_cast %10 : vector<1x2x10xf32> to vector<2x10xf32>
    %c0_12 = arith.constant 0 : index
    %c0_13 = arith.constant 0 : index
    %12 = vector.load %arg4[%c0_12, %c0_13] : memref<16x40xf32, #tpu.memory_space<vmem>>, vector<2x40xf32>
    %cst_14 = arith.constant dense<0.000000e+00> : vector<2x40xf32>
    %13 = tpu.matmul %9, %1, %cst_14 {dimension_numbers = #tpu.dot_dimension_numbers<[1], [0], [0], [1], [0, 0, 1, 1], [], []>} : vector<2x10xf32>, vector<10x40xf32>, vector<2x40xf32> -> vector<2x40xf32>
    %14 = arith.addf %12, %13 : vector<2x40xf32>
    %15 = arith.negf %14 : vector<2x40xf32>
    %16 = math.exp %15 : vector<2x40xf32>
    %cst_15 = arith.constant 1.000000e+00 : f32
    %17 = vector.broadcast %cst_15 : f32 to vector<2x40xf32>
    %18 = arith.addf %17, %16 : vector<2x40xf32>
    %19 = arith.divf %17, %18 : vector<2x40xf32>
    %20 = math.tanh %14 : vector<2x40xf32>
    %21 = vector.extract_strided_slice %19 {offsets = [0, 0], sizes = [2, 10], strides = [1, 1]} : vector<2x40xf32> to vector<2x10xf32>
    %22 = vector.extract_strided_slice %19 {offsets = [0, 10], sizes = [2, 10], strides = [1, 1]} : vector<2x40xf32> to vector<2x10xf32>
    %23 = vector.extract_strided_slice %19 {offsets = [0, 20], sizes = [2, 10], strides = [1, 1]} : vector<2x40xf32> to vector<2x10xf32>
    %24 = vector.extract_strided_slice %20 {offsets = [0, 30], sizes = [2, 10], strides = [1, 1]} : vector<2x40xf32> to vector<2x10xf32>
    %25 = arith.mulf %22, %11 : vector<2x10xf32>
    %26 = arith.mulf %21, %24 : vector<2x10xf32>
    %27 = arith.addf %25, %26 : vector<2x10xf32>
    %28 = math.tanh %27 : vector<2x10xf32>
    %29 = arith.mulf %23, %28 : vector<2x10xf32>
    %c0_16 = arith.constant 0 : index
    %c0_17 = arith.constant 0 : index
    %c0_18 = arith.constant 0 : index
    %30 = vector.load %arg3[%c0_16, %c0_17, %c0_18] : memref<9x2x10xf32, #tpu.memory_space<vmem>>, vector<1x2x10xf32>
    %31 = vector.shape_cast %30 : vector<1x2x10xf32> to vector<2x10xf32>
    %32 = vector.shape_cast %29 : vector<2x10xf32> to vector<1x2x10xf32>
    tpu.vector_store %arg3[%c0_16, %c0_17, %c0_18], %32 {strides = array<i32>} : memref<9x2x10xf32, #tpu.memory_space<vmem>>, vector<1x2x10xf32>,
    %c2 = arith.constant 2 : index
    %c0_19 = arith.constant 0 : index
    %33 = vector.load %arg4[%c2, %c0_19] : memref<16x40xf32, #tpu.memory_space<vmem>>, vector<2x40xf32>
    %cst_20 = arith.constant dense<0.000000e+00> : vector<2x40xf32>
    %34 = tpu.matmul %29, %1, %cst_20 {dimension_numbers = #tpu.dot_dimension_numbers<[1], [0], [0], [1], [0, 0, 1, 1], [], []>} : vector<2x10xf32>, vector<10x40xf32>, vector<2x40xf32> -> vector<2x40xf32>
    %35 = arith.addf %33, %34 : vector<2x40xf32>
    %36 = arith.negf %35 : vector<2x40xf32>
    %37 = math.exp %36 : vector<2x40xf32>
    %cst_21 = arith.constant 1.000000e+00 : f32
    %38 = vector.broadcast %cst_21 : f32 to vector<2x40xf32>
    %39 = arith.addf %38, %37 : vector<2x40xf32>
    %40 = arith.divf %38, %39 : vector<2x40xf32>
    %41 = math.tanh %35 : vector<2x40xf32>
    %42 = vector.extract_strided_slice %40 {offsets = [0, 0], sizes = [2, 10], strides = [1, 1]} : vector<2x40xf32> to vector<2x10xf32>
    %43 = vector.extract_strided_slice %40 {offsets = [0, 10], sizes = [2, 10], strides = [1, 1]} : vector<2x40xf32> to vector<2x10xf32>
    %44 = vector.extract_strided_slice %40 {offsets = [0, 20], sizes = [2, 10], strides = [1, 1]} : vector<2x40xf32> to vector<2x10xf32>
    %45 = vector.extract_strided_slice %41 {offsets = [0, 30], sizes = [2, 10], strides = [1, 1]} : vector<2x40xf32> to vector<2x10xf32>
    %46 = arith.mulf %43, %27 : vector<2x10xf32>
    %47 = arith.mulf %42, %45 : vector<2x10xf32>
    %48 = arith.addf %46, %47 : vector<2x10xf32>
    %49 = math.tanh %48 : vector<2x10xf32>
    %50 = arith.mulf %44, %49 : vector<2x10xf32>
    %c1_22 = arith.constant 1 : index
    %c0_23 = arith.constant 0 : index
    %c0_24 = arith.constant 0 : index
    %51 = vector.load %arg3[%c1_22, %c0_23, %c0_24] : memref<9x2x10xf32, #tpu.memory_space<vmem>>, vector<1x2x10xf32>
    %52 = vector.shape_cast %51 : vector<1x2x10xf32> to vector<2x10xf32>
    %53 = vector.shape_cast %50 : vector<2x10xf32> to vector<1x2x10xf32>
    tpu.vector_store %arg3[%c1_22, %c0_23, %c0_24], %53 {strides = array<i32>} : memref<9x2x10xf32, #tpu.memory_space<vmem>>, vector<1x2x10xf32>,
    %c4 = arith.constant 4 : index
    %c0_25 = arith.constant 0 : index
    %54 = vector.load %arg4[%c4, %c0_25] : memref<16x40xf32, #tpu.memory_space<vmem>>, vector<2x40xf32>
    %cst_26 = arith.constant dense<0.000000e+00> : vector<2x40xf32>
    %55 = tpu.matmul %50, %1, %cst_26 {dimension_numbers = #tpu.dot_dimension_numbers<[1], [0], [0], [1], [0, 0, 1, 1], [], []>} : vector<2x10xf32>, vector<10x40xf32>, vector<2x40xf32> -> vector<2x40xf32>
    %56 = arith.addf %54, %55 : vector<2x40xf32>
    %57 = arith.negf %56 : vector<2x40xf32>
    %58 = math.exp %57 : vector<2x40xf32>
    %cst_27 = arith.constant 1.000000e+00 : f32
    %59 = vector.broadcast %cst_27 : f32 to vector<2x40xf32>
    %60 = arith.addf %59, %58 : vector<2x40xf32>
    %61 = arith.divf %59, %60 : vector<2x40xf32>
    %62 = math.tanh %56 : vector<2x40xf32>
    %63 = vector.extract_strided_slice %61 {offsets = [0, 0], sizes = [2, 10], strides = [1, 1]} : vector<2x40xf32> to vector<2x10xf32>
    %64 = vector.extract_strided_slice %61 {offsets = [0, 10], sizes = [2, 10], strides = [1, 1]} : vector<2x40xf32> to vector<2x10xf32>
    %65 = vector.extract_strided_slice %61 {offsets = [0, 20], sizes = [2, 10], strides = [1, 1]} : vector<2x40xf32> to vector<2x10xf32>
    %66 = vector.extract_strided_slice %62 {offsets = [0, 30], sizes = [2, 10], strides = [1, 1]} : vector<2x40xf32> to vector<2x10xf32>
    %67 = arith.mulf %64, %48 : vector<2x10xf32>
    %68 = arith.mulf %63, %66 : vector<2x10xf32>
    %69 = arith.addf %67, %68 : vector<2x10xf32>
    %70 = math.tanh %69 : vector<2x10xf32>
    %71 = arith.mulf %65, %70 : vector<2x10xf32>
    %c2_28 = arith.constant 2 : index
    %c0_29 = arith.constant 0 : index
    %c0_30 = arith.constant 0 : index
    %72 = vector.load %arg3[%c2_28, %c0_29, %c0_30] : memref<9x2x10xf32, #tpu.memory_space<vmem>>, vector<1x2x10xf32>
    %73 = vector.shape_cast %72 : vector<1x2x10xf32> to vector<2x10xf32>
    %74 = vector.shape_cast %71 : vector<2x10xf32> to vector<1x2x10xf32>
    tpu.vector_store %arg3[%c2_28, %c0_29, %c0_30], %74 {strides = array<i32>} : memref<9x2x10xf32, #tpu.memory_space<vmem>>, vector<1x2x10xf32>,
    %c6 = arith.constant 6 : index
    %c0_31 = arith.constant 0 : index
    %75 = vector.load %arg4[%c6, %c0_31] : memref<16x40xf32, #tpu.memory_space<vmem>>, vector<2x40xf32>
    %cst_32 = arith.constant dense<0.000000e+00> : vector<2x40xf32>
    %76 = tpu.matmul %71, %1, %cst_32 {dimension_numbers = #tpu.dot_dimension_numbers<[1], [0], [0], [1], [0, 0, 1, 1], [], []>} : vector<2x10xf32>, vector<10x40xf32>, vector<2x40xf32> -> vector<2x40xf32>
    %77 = arith.addf %75, %76 : vector<2x40xf32>
    %78 = arith.negf %77 : vector<2x40xf32>
    %79 = math.exp %78 : vector<2x40xf32>
    %cst_33 = arith.constant 1.000000e+00 : f32
    %80 = vector.broadcast %cst_33 : f32 to vector<2x40xf32>
    %81 = arith.addf %80, %79 : vector<2x40xf32>
    %82 = arith.divf %80, %81 : vector<2x40xf32>
    %83 = math.tanh %77 : vector<2x40xf32>
    %84 = vector.extract_strided_slice %82 {offsets = [0, 0], sizes = [2, 10], strides = [1, 1]} : vector<2x40xf32> to vector<2x10xf32>
    %85 = vector.extract_strided_slice %82 {offsets = [0, 10], sizes = [2, 10], strides = [1, 1]} : vector<2x40xf32> to vector<2x10xf32>
    %86 = vector.extract_strided_slice %82 {offsets = [0, 20], sizes = [2, 10], strides = [1, 1]} : vector<2x40xf32> to vector<2x10xf32>
    %87 = vector.extract_strided_slice %83 {offsets = [0, 30], sizes = [2, 10], strides = [1, 1]} : vector<2x40xf32> to vector<2x10xf32>
    %88 = arith.mulf %85, %69 : vector<2x10xf32>
    %89 = arith.mulf %84, %87 : vector<2x10xf32>
    %90 = arith.addf %88, %89 : vector<2x10xf32>
    %91 = math.tanh %90 : vector<2x10xf32>
    %92 = arith.mulf %86, %91 : vector<2x10xf32>
    %c3 = arith.constant 3 : index
    %c0_34 = arith.constant 0 : index
    %c0_35 = arith.constant 0 : index
    %93 = vector.load %arg3[%c3, %c0_34, %c0_35] : memref<9x2x10xf32, #tpu.memory_space<vmem>>, vector<1x2x10xf32>
    %94 = vector.shape_cast %93 : vector<1x2x10xf32> to vector<2x10xf32>
    %95 = vector.shape_cast %92 : vector<2x10xf32> to vector<1x2x10xf32>
    tpu.vector_store %arg3[%c3, %c0_34, %c0_35], %95 {strides = array<i32>} : memref<9x2x10xf32, #tpu.memory_space<vmem>>, vector<1x2x10xf32>,
    %c8 = arith.constant 8 : index
    %c0_36 = arith.constant 0 : index
    %96 = vector.load %arg4[%c8, %c0_36] : memref<16x40xf32, #tpu.memory_space<vmem>>, vector<2x40xf32>
    %cst_37 = arith.constant dense<0.000000e+00> : vector<2x40xf32>
    %97 = tpu.matmul %92, %1, %cst_37 {dimension_numbers = #tpu.dot_dimension_numbers<[1], [0], [0], [1], [0, 0, 1, 1], [], []>} : vector<2x10xf32>, vector<10x40xf32>, vector<2x40xf32> -> vector<2x40xf32>
    %98 = arith.addf %96, %97 : vector<2x40xf32>
    %99 = arith.negf %98 : vector<2x40xf32>
    %100 = math.exp %99 : vector<2x40xf32>
    %cst_38 = arith.constant 1.000000e+00 : f32
    %101 = vector.broadcast %cst_38 : f32 to vector<2x40xf32>
    %102 = arith.addf %101, %100 : vector<2x40xf32>
    %103 = arith.divf %101, %102 : vector<2x40xf32>
    %104 = math.tanh %98 : vector<2x40xf32>
    %105 = vector.extract_strided_slice %103 {offsets = [0, 0], sizes = [2, 10], strides = [1, 1]} : vector<2x40xf32> to vector<2x10xf32>
    %106 = vector.extract_strided_slice %103 {offsets = [0, 10], sizes = [2, 10], strides = [1, 1]} : vector<2x40xf32> to vector<2x10xf32>
    %107 = vector.extract_strided_slice %103 {offsets = [0, 20], sizes = [2, 10], strides = [1, 1]} : vector<2x40xf32> to vector<2x10xf32>
    %108 = vector.extract_strided_slice %104 {offsets = [0, 30], sizes = [2, 10], strides = [1, 1]} : vector<2x40xf32> to vector<2x10xf32>
    %109 = arith.mulf %106, %90 : vector<2x10xf32>
    %110 = arith.mulf %105, %108 : vector<2x10xf32>
    %111 = arith.addf %109, %110 : vector<2x10xf32>
    %112 = math.tanh %111 : vector<2x10xf32>
    %113 = arith.mulf %107, %112 : vector<2x10xf32>
    %c4_39 = arith.constant 4 : index
    %c0_40 = arith.constant 0 : index
    %c0_41 = arith.constant 0 : index
    %114 = vector.load %arg3[%c4_39, %c0_40, %c0_41] : memref<9x2x10xf32, #tpu.memory_space<vmem>>, vector<1x2x10xf32>
    %115 = vector.shape_cast %114 : vector<1x2x10xf32> to vector<2x10xf32>
    %116 = vector.shape_cast %113 : vector<2x10xf32> to vector<1x2x10xf32>
    tpu.vector_store %arg3[%c4_39, %c0_40, %c0_41], %116 {strides = array<i32>} : memref<9x2x10xf32, #tpu.memory_space<vmem>>, vector<1x2x10xf32>,
    %c10 = arith.constant 10 : index
    %c0_42 = arith.constant 0 : index
    %117 = vector.load %arg4[%c10, %c0_42] : memref<16x40xf32, #tpu.memory_space<vmem>>, vector<2x40xf32>
    %cst_43 = arith.constant dense<0.000000e+00> : vector<2x40xf32>
    %118 = tpu.matmul %113, %1, %cst_43 {dimension_numbers = #tpu.dot_dimension_numbers<[1], [0], [0], [1], [0, 0, 1, 1], [], []>} : vector<2x10xf32>, vector<10x40xf32>, vector<2x40xf32> -> vector<2x40xf32>
    %119 = arith.addf %117, %118 : vector<2x40xf32>
    %120 = arith.negf %119 : vector<2x40xf32>
    %121 = math.exp %120 : vector<2x40xf32>
    %cst_44 = arith.constant 1.000000e+00 : f32
    %122 = vector.broadcast %cst_44 : f32 to vector<2x40xf32>
    %123 = arith.addf %122, %121 : vector<2x40xf32>
    %124 = arith.divf %122, %123 : vector<2x40xf32>
    %125 = math.tanh %119 : vector<2x40xf32>
    %126 = vector.extract_strided_slice %124 {offsets = [0, 0], sizes = [2, 10], strides = [1, 1]} : vector<2x40xf32> to vector<2x10xf32>
    %127 = vector.extract_strided_slice %124 {offsets = [0, 10], sizes = [2, 10], strides = [1, 1]} : vector<2x40xf32> to vector<2x10xf32>
    %128 = vector.extract_strided_slice %124 {offsets = [0, 20], sizes = [2, 10], strides = [1, 1]} : vector<2x40xf32> to vector<2x10xf32>
    %129 = vector.extract_strided_slice %125 {offsets = [0, 30], sizes = [2, 10], strides = [1, 1]} : vector<2x40xf32> to vector<2x10xf32>
    %130 = arith.mulf %127, %111 : vector<2x10xf32>
    %131 = arith.mulf %126, %129 : vector<2x10xf32>
    %132 = arith.addf %130, %131 : vector<2x10xf32>
    %133 = math.tanh %132 : vector<2x10xf32>
    %134 = arith.mulf %128, %133 : vector<2x10xf32>
    %c5 = arith.constant 5 : index
    %c0_45 = arith.constant 0 : index
    %c0_46 = arith.constant 0 : index
    %135 = vector.load %arg3[%c5, %c0_45, %c0_46] : memref<9x2x10xf32, #tpu.memory_space<vmem>>, vector<1x2x10xf32>
    %136 = vector.shape_cast %135 : vector<1x2x10xf32> to vector<2x10xf32>
    %137 = vector.shape_cast %134 : vector<2x10xf32> to vector<1x2x10xf32>
    tpu.vector_store %arg3[%c5, %c0_45, %c0_46], %137 {strides = array<i32>} : memref<9x2x10xf32, #tpu.memory_space<vmem>>, vector<1x2x10xf32>,
    %c12 = arith.constant 12 : index
    %c0_47 = arith.constant 0 : index
    %138 = vector.load %arg4[%c12, %c0_47] : memref<16x40xf32, #tpu.memory_space<vmem>>, vector<2x40xf32>
    %cst_48 = arith.constant dense<0.000000e+00> : vector<2x40xf32>
    %139 = tpu.matmul %134, %1, %cst_48 {dimension_numbers = #tpu.dot_dimension_numbers<[1], [0], [0], [1], [0, 0, 1, 1], [], []>} : vector<2x10xf32>, vector<10x40xf32>, vector<2x40xf32> -> vector<2x40xf32>
    %140 = arith.addf %138, %139 : vector<2x40xf32>
    %141 = arith.negf %140 : vector<2x40xf32>
    %142 = math.exp %141 : vector<2x40xf32>
    %cst_49 = arith.constant 1.000000e+00 : f32
    %143 = vector.broadcast %cst_49 : f32 to vector<2x40xf32>
    %144 = arith.addf %143, %142 : vector<2x40xf32>
    %145 = arith.divf %143, %144 : vector<2x40xf32>
    %146 = math.tanh %140 : vector<2x40xf32>
    %147 = vector.extract_strided_slice %145 {offsets = [0, 0], sizes = [2, 10], strides = [1, 1]} : vector<2x40xf32> to vector<2x10xf32>
    %148 = vector.extract_strided_slice %145 {offsets = [0, 10], sizes = [2, 10], strides = [1, 1]} : vector<2x40xf32> to vector<2x10xf32>
    %149 = vector.extract_strided_slice %145 {offsets = [0, 20], sizes = [2, 10], strides = [1, 1]} : vector<2x40xf32> to vector<2x10xf32>
    %150 = vector.extract_strided_slice %146 {offsets = [0, 30], sizes = [2, 10], strides = [1, 1]} : vector<2x40xf32> to vector<2x10xf32>
    %151 = arith.mulf %148, %132 : vector<2x10xf32>
    %152 = arith.mulf %147, %150 : vector<2x10xf32>
    %153 = arith.addf %151, %152 : vector<2x10xf32>
    %154 = math.tanh %153 : vector<2x10xf32>
    %155 = arith.mulf %149, %154 : vector<2x10xf32>
    %c6_50 = arith.constant 6 : index
    %c0_51 = arith.constant 0 : index
    %c0_52 = arith.constant 0 : index
    %156 = vector.load %arg3[%c6_50, %c0_51, %c0_52] : memref<9x2x10xf32, #tpu.memory_space<vmem>>, vector<1x2x10xf32>
    %157 = vector.shape_cast %156 : vector<1x2x10xf32> to vector<2x10xf32>
    %158 = vector.shape_cast %155 : vector<2x10xf32> to vector<1x2x10xf32>
    tpu.vector_store %arg3[%c6_50, %c0_51, %c0_52], %158 {strides = array<i32>} : memref<9x2x10xf32, #tpu.memory_space<vmem>>, vector<1x2x10xf32>,
    %c14 = arith.constant 14 : index
    %c0_53 = arith.constant 0 : index
    %159 = vector.load %arg4[%c14, %c0_53] : memref<16x40xf32, #tpu.memory_space<vmem>>, vector<2x40xf32>
    %cst_54 = arith.constant dense<0.000000e+00> : vector<2x40xf32>
    %160 = tpu.matmul %155, %1, %cst_54 {dimension_numbers = #tpu.dot_dimension_numbers<[1], [0], [0], [1], [0, 0, 1, 1], [], []>} : vector<2x10xf32>, vector<10x40xf32>, vector<2x40xf32> -> vector<2x40xf32>
    %161 = arith.addf %159, %160 : vector<2x40xf32>
    %162 = arith.negf %161 : vector<2x40xf32>
    %163 = math.exp %162 : vector<2x40xf32>
    %cst_55 = arith.constant 1.000000e+00 : f32
    %164 = vector.broadcast %cst_55 : f32 to vector<2x40xf32>
    %165 = arith.addf %164, %163 : vector<2x40xf32>
    %166 = arith.divf %164, %165 : vector<2x40xf32>
    %167 = math.tanh %161 : vector<2x40xf32>
    %168 = vector.extract_strided_slice %166 {offsets = [0, 0], sizes = [2, 10], strides = [1, 1]} : vector<2x40xf32> to vector<2x10xf32>
    %169 = vector.extract_strided_slice %166 {offsets = [0, 10], sizes = [2, 10], strides = [1, 1]} : vector<2x40xf32> to vector<2x10xf32>
    %170 = vector.extract_strided_slice %166 {offsets = [0, 20], sizes = [2, 10], strides = [1, 1]} : vector<2x40xf32> to vector<2x10xf32>
    %171 = vector.extract_strided_slice %167 {offsets = [0, 30], sizes = [2, 10], strides = [1, 1]} : vector<2x40xf32> to vector<2x10xf32>
    %172 = arith.mulf %169, %153 : vector<2x10xf32>
    %173 = arith.mulf %168, %171 : vector<2x10xf32>
    %174 = arith.addf %172, %173 : vector<2x10xf32>
    %175 = math.tanh %174 : vector<2x10xf32>
    %176 = arith.mulf %170, %175 : vector<2x10xf32>
    %c7 = arith.constant 7 : index
    %c0_56 = arith.constant 0 : index
    %c0_57 = arith.constant 0 : index
    %177 = vector.load %arg3[%c7, %c0_56, %c0_57] : memref<9x2x10xf32, #tpu.memory_space<vmem>>, vector<1x2x10xf32>
    %178 = vector.shape_cast %177 : vector<1x2x10xf32> to vector<2x10xf32>
    %179 = vector.shape_cast %176 : vector<2x10xf32> to vector<1x2x10xf32>
    tpu.vector_store %arg3[%c7, %c0_56, %c0_57], %179 {strides = array<i32>} : memref<9x2x10xf32, #tpu.memory_space<vmem>>, vector<1x2x10xf32>,
    %c8_58 = arith.constant 8 : index
    %c0_59 = arith.constant 0 : index
    %c0_60 = arith.constant 0 : index
    %180 = vector.load %arg3[%c8_58, %c0_59, %c0_60] : memref<9x2x10xf32, #tpu.memory_space<vmem>>, vector<1x2x10xf32>
    %181 = vector.shape_cast %180 : vector<1x2x10xf32> to vector<2x10xf32>
    %182 = vector.shape_cast %174 : vector<2x10xf32> to vector<1x2x10xf32>
    tpu.vector_store %arg3[%c8_58, %c0_59, %c0_60], %182 {strides = array<i32>} : memref<9x2x10xf32, #tpu.memory_space<vmem>>, vector<1x2x10xf32>,
    return
  }
}

</mosaic_0001>

<bundles_post_ra>
// kernel: tpu_custom_call.1
= control target key start
LH: loop header
LB: loop body
LE: loop exit
PB: predicated region body
PF: predicated region fallthrough
CT: control target
= control target key end

     0   :  { %vm68_vm0 = vcmask 1041408   ;;  %vm64_vm1 = vcmask 80896   ;;  %s913_s0 = inlined_call_operand.vmem [shape: f32[16,48], index: 0, kind: input, shape index: {}]   ;;  %s914_s1 = inlined_call_operand.vmem [shape: f32[2,2,10], index: 1, kind: input, shape index: {}]   ;;  %s915_s2 = inlined_call_operand.vmem [shape: f32[59,40], index: 2, kind: input, shape index: {}]   ;;  %s916_s3 = inlined_call_operand.hbm [shape: f32[9,2,10], index: 3, kind: output, shape index: {}]  }
   0x1   :  { %v20_v0 = vld [vmem:[%s915_s2 + $0x28] sm:$0xff]  ;;  %v19_v1 = vld [vmem:[%s915_s2 + $0x20] sm:$0xff]  ;;  %v18_v2 = vld [vmem:[%s915_s2 + $0x18] sm:$0xff] }
   0x2   :  { %44 = vmatpush.msra.mxu0 %v20_v0  ;;  %v797_v3 = vld [vmem:[%s915_s2 + $0x38] sm:$0x3]  ;;  %v802_v4 = vld [vmem:[%s915_s2 + $0x30] sm:$0xff]  ;;  %v60_v5 = vld [vmem:[%s914_s1] sm:$0x3] }
   0x3   :  { %636 = vmatpush.msk.msra.mxu1 %vm68_vm0, %v797_v3  ;;  %v17_v6 = vld [vmem:[%s915_s2 + $0x10] sm:$0xff]  ;;  %639 = vmatpush.msk.msra.mxu2 %vm68_vm0, %v797_v3 }
   0x4   :  { %45 = vmatpush.msra.mxu0 %v19_v1  ;;  %642 = vmatpush.msk.msra.mxu3 %vm68_vm0, %v797_v3 }
   0x5   :  { %8 = vsyncpa [#allocation4], 0  ;;  %87 = vmatpush.msra.mxu1 %v802_v4  ;;  %v16_v7 = vld [vmem:[%s915_s2 + $0x8] sm:$0xff]  ;;  %158 = vmatpush.msra.mxu2 %v802_v4  ;;  %v15_v8 = vld [vmem:[%s915_s2] sm:$0xff]  ;;  %vm27_vm2 = vcmask 392192   ;;  %vm57_vm3 = vcmask 326656  }
   0x6   :  { %46 = vmatpush.msra.mxu0 %v18_v2  ;;  %637 = vmatmul.msk.f32.vlgmr.msra.gmra.mxu1 %vm64_vm1, %v60_v5  ;;  %v24_v9 = vld [vmem:[%s913_s0] sm:$0xff]  ;;  %v845_v10 = vld [vmem:[%s915_s2 + $0x3a] ss:$0 sm:$0xff]  ;;  %s758_s7 = smov 98   ;;  %s759_s2 = smov 10   ;;  %vm138_vm8 = vcmask 74752  }
   0x7   :  { %225 = vmatpush.msra.mxu3 %v802_v4  ;;  %645 = vmatpush.msk.msrb.mxu1 %vm68_vm0, %v797_v3  ;;  %v635_v17 = vld [vmem:[%s914_s1 + $0x2] sm:$0x3]  ;;  %s760_s1 = smov 108   ;;  %s762_s12 = smov [#allocation3]  }
   0x8   :  { %47 = vmatpush.msra.mxu0 %v17_v6  ;;  %648 = vmatpush.msk.msrb.mxu2 %vm68_vm0, %v797_v3  ;;  %s619_s13 = sshll.u32 %s762_s12, 4  ;;  %s621_s16 = sshll.u32 %s916_s3, 4  ;;  %s620_s13 = int_to_ptr.vmem [resolvable:$true] %s619_s13  ;;  %s622_s16 = int_to_ptr.hbm [resolvable:$true] %s621_s16 }
   0x9   :  { %651 = vmatpush.msk.msrb.mxu3 %vm68_vm0, %v797_v3  ;;  %292 = vmatpush.msrb.mxu1 %v802_v4  ;;  %s763_s17 = smov 32   ;;  %s764_s18 = smov 2  }
   0xa   :  { %48 = vmatpush.msra.mxu0 %v16_v7  ;;  %359 = vmatpush.msrb.mxu2 %v802_v4 }
   0xb   :  { %426 = vmatpush.msrb.mxu3 %v802_v4  ;;  %654 = vmatpush.msk.msra.mxu1 %vm68_vm0, %v797_v3 }
   0xc   :  { %49 = vmatpush.msra.mxu0 %v15_v8 }
   0xd   :  { %633 = vmatmul.msk.f32.vlgmr.msra.gmra.mxu0 %vm27_vm2, %v24_v9  ;;  %493 = vmatpush.msra.mxu1 %v802_v4 }
  0x83   :  { %v89_v13 = vpop.f32.mrf.mxu1 }
  0x8a   :  { %v51_v11 = vpop.f32.mrf.mxu0 }
  0x8b   :  { %v52_v12 = vadd.f32 %v845_v10, %v51_v11 }
  0x8d   :  { %58 = vst.msk [vmem:[#allocation2] sm:$0xff] %vm57_vm3, %v52_v12 }
  0x94   :  { %v63_v14 = vld [vmem:[#allocation2] sm:$0x3]  ;;  %v140_v41 = vld [vmem:[#allocation2 + $0x2] sm:$0x3] }
  0x95   :  { %v92_v15 = vadd.f32 %v89_v13, %v63_v14 }
  0x97   :  { %668 = vtanh.f32 %v92_v15  ;;  %v638_v18 = vmul.f32 -1.442695, %v92_v15 }
  0x99   :  { %670 = vpow2.f32 %v638_v18 }
  0x9d   :  { %v669_v16 = vpop.eup %668 }
  0x9e   :  { %119 = vrot.lane.b32.xlu0 %v669_v16, %s758_s7 }
  0x9f   :  { %v671_v19 = vpop.eup %670 }
  0xa0   :  { %v96_v20 = vadd.f32 1.0, %v671_v19 }
  0xa2   :  { %672 = vrcp.f32 %v96_v20  ;;  %v108_v26 = vand.u32 2147483648, %v96_v20  ;;  %vm102_vm5 = vweird.f32 %v96_v20  ;;  %v106_v27 = vand.u32 2147483647, %v96_v20 }
  0xa4   :  { %v109_v29 = vor.u32 1.1754944e-38, %v108_v26  ;;  %vm107_vm7 = vcmp.eq.f32.partialorder %v106_v27, 8.507059e+37 }
  0xa6   :  { %114 = vrot.lane.b32.xlu0 %v635_v17, %s759_s2 }
  0xa8   :  { %v673_v21 = vpop.eup %672 }
  0xa9   :  { %v98_v22 = vmul.f32 %v673_v21, %v96_v20  ;;  %vm103_vm4 = vweird.f32 %v673_v21 }
  0xaa   :  { %vm104_vm6 = vmor %vm102_vm5, %vm103_vm4 }
  0xab   :  { %v99_v23 = vsub.f32 1.0, %v98_v22 }
  0xad   :  { %v100_v24 = vmul.f32 %v673_v21, %v99_v23 }
  0xaf   :  { %v101_v25 = vadd.f32 %v673_v21, %v100_v24 }
  0xb1   :  { %v105_v28 = vsel %vm104_vm6, %v673_v21, %v101_v25 }
  0xb2   :  { %v110_v31 = vsel %vm107_vm7, %v109_v29, %v105_v28 }
 0x110   :  { %v120_v30 = vpop.permute.xlu0 %119 }
 0x111   :  { %v122_v32 = vmul.f32 %v120_v30, %v110_v31  ;;  %v274_v30 = vld [vmem:[#allocation2 + $0x6] sm:$0x3] }
 0x113   :  { %124 = vrot.lane.b32.xlu1 %v122_v32, %s759_s2 }
 0x118   :  { %v115_v33 = vpop.permute.xlu0 %114 }
 0x119   :  { %v117_v34 = vmul.f32 %v115_v33, %v110_v31 }
 0x185   :  { %v125_v35 = vpop.permute.xlu1 %124 }
 0x186   :  { %v127_v36 = vadd.f32 %v125_v35, %v117_v34 }
 0x188   :  { %674 = vtanh.f32 %v127_v36 }
 0x18e   :  { %v675_v37 = vpop.eup %674 }
 0x18f   :  { %130 = vrot.lane.b32.xlu1 %v675_v37, %s759_s2 }
 0x201   :  { %v131_v38 = vpop.permute.xlu1 %130 }
 0x202   :  { %v133_v39 = vmul.f32 %v131_v38, %v110_v31 }
 0x204   :  { %135 = vrot.lane.b32.xlu2 %v133_v39, %s760_s1 }
 0x25e   :  { %v136_v40 = vpop.permute.xlu2 %135 }
 0x25f   :  { %139 = vst.msk [vmem:[#allocation3] sm:$0x3] %vm138_vm8, %v136_v40  ;;  %640 = vmatmul.msk.f32.vlgmr.msra.gmra.mxu2 %vm64_vm1, %v136_v40 }
 0x260   :  { %657 = vmatpush.msk.msra.mxu2 %vm68_vm0, %v797_v3  ;;  %v207_v3 = vld [vmem:[#allocation2 + $0x4] sm:$0x3] }
 0x262   :  { %560 = vmatpush.msra.mxu2 %v802_v4 }
 0x2e2   :  { %v160_v42 = vpop.f32.mrf.mxu2 }
 0x2e3   :  { %v163_v43 = vadd.f32 %v160_v42, %v140_v41 }
 0x2e5   :  { %676 = vtanh.f32 %v163_v43  ;;  %v641_v45 = vmul.f32 -1.442695, %v163_v43 }
 0x2e7   :  { %678 = vpow2.f32 %v641_v45 }
 0x2eb   :  { %v677_v44 = vpop.eup %676 }
 0x2ec   :  { %186 = vrot.lane.b32.xlu2 %v677_v44, %s758_s7 }
 0x2ed   :  { %v679_v46 = vpop.eup %678 }
 0x2ee   :  { %v167_v47 = vadd.f32 1.0, %v679_v46 }
 0x2f0   :  { %680 = vrcp.f32 %v167_v47  ;;  %v179_v53 = vand.u32 2147483648, %v167_v47  ;;  %vm173_vm10 = vweird.f32 %v167_v47  ;;  %v177_v54 = vand.u32 2147483647, %v167_v47 }
 0x2f2   :  { %v180_v56 = vor.u32 1.1754944e-38, %v179_v53  ;;  %vm178_vm12 = vcmp.eq.f32.partialorder %v177_v54, 8.507059e+37  ;;  %v25_v53 = vld [vmem:[%s913_s0 + $0x8] sm:$0xff]  ;;  %s761_s0 = smov 118  }
 0x2f3   :  { %634 = vmatmul.msk.f32.gmra.mxu0 %vm27_vm2, %v25_v53 }
 0x2f6   :  { %v681_v48 = vpop.eup %680 }
 0x2f7   :  { %v169_v49 = vmul.f32 %v681_v48, %v167_v47  ;;  %vm174_vm9 = vweird.f32 %v681_v48 }
 0x2f8   :  { %vm175_vm11 = vmor %vm173_vm10, %vm174_vm9 }
 0x2f9   :  { %v170_v50 = vsub.f32 1.0, %v169_v49 }
 0x2fb   :  { %v171_v51 = vmul.f32 %v681_v48, %v170_v50 }
 0x2fd   :  { %v172_v52 = vadd.f32 %v681_v48, %v171_v51 }
 0x2ff   :  { %v176_v55 = vsel %vm175_vm11, %v681_v48, %v172_v52 }
 0x300   :  { %v181_v58 = vsel %vm178_vm12, %v180_v56, %v176_v55 }
 0x301   :  { %v184_v60 = vmul.f32 %v181_v58, %v127_v36 }
 0x346   :  { %v187_v57 = vpop.permute.xlu2 %186 }
 0x347   :  { %v189_v59 = vmul.f32 %v187_v57, %v181_v58 }
 0x349   :  { %191 = vrot.lane.b32.xlu0 %v189_v59, %s759_s2 }
 0x370   :  { %v54_v56 = vpop.f32.mrf.mxu0 }
 0x371   :  { %v55_v57 = vadd.f32 %v845_v10, %v54_v56 }
 0x373   :  { %59 = vst.msk [vmem:[#allocation2 + $0x8] sm:$0xff] %vm57_vm3, %v55_v57 }
 0x37a   :  { %v341_v59 = vld [vmem:[#allocation2 + $0x8] sm:$0x3] }
 0x3bb   :  { %v192_v61 = vpop.permute.xlu0 %191 }
 0x3bc   :  { %v194_v62 = vadd.f32 %v192_v61, %v184_v60 }
 0x3be   :  { %682 = vtanh.f32 %v194_v62 }
 0x3c4   :  { %v683_v63 = vpop.eup %682 }
 0x3c5   :  { %197 = vrot.lane.b32.xlu1 %v683_v63, %s759_s2 }
 0x437   :  { %v198_v0 = vpop.permute.xlu1 %197 }
 0x438   :  { %v200_v1 = vmul.f32 %v198_v0, %v181_v58 }
 0x43a   :  { %202 = vrot.lane.b32.xlu2 %v200_v1, %s760_s1 }
 0x494   :  { %v203_v2 = vpop.permute.xlu2 %202 }
 0x495   :  { %206 = vst.msk [vmem:[#allocation3 + $0x2] sm:$0x3] %vm138_vm8, %v203_v2  ;;  %643 = vmatmul.msk.f32.vlgmr.msra.gmra.mxu3 %vm64_vm1, %v203_v2 }
 0x518   :  { %v227_v4 = vpop.f32.mrf.mxu3 }
 0x519   :  { %v230_v5 = vadd.f32 %v227_v4, %v207_v3 }
 0x51b   :  { %684 = vtanh.f32 %v230_v5  ;;  %v644_v7 = vmul.f32 -1.442695, %v230_v5 }
 0x51d   :  { %686 = vpow2.f32 %v644_v7 }
 0x521   :  { %v685_v6 = vpop.eup %684 }
 0x522   :  { %253 = vrot.lane.b32.xlu0 %v685_v6, %s758_s7 }
 0x523   :  { %v687_v8 = vpop.eup %686 }
 0x524   :  { %v234_v9 = vadd.f32 1.0, %v687_v8 }
 0x526   :  { %688 = vrcp.f32 %v234_v9  ;;  %v246_v16 = vand.u32 2147483648, %v234_v9  ;;  %vm240_vm14 = vweird.f32 %v234_v9  ;;  %v244_v17 = vand.u32 2147483647, %v234_v9 }
 0x528   :  { %v247_v19 = vor.u32 1.1754944e-38, %v246_v16  ;;  %vm245_vm0 = vcmp.eq.f32.partialorder %v244_v17, 8.507059e+37 }
 0x52c   :  { %v689_v11 = vpop.eup %688 }
 0x52d   :  { %v236_v12 = vmul.f32 %v689_v11, %v234_v9  ;;  %vm241_vm13 = vweird.f32 %v689_v11 }
 0x52e   :  { %vm242_vm15 = vmor %vm240_vm14, %vm241_vm13 }
 0x52f   :  { %v237_v13 = vsub.f32 1.0, %v236_v12 }
 0x531   :  { %v238_v14 = vmul.f32 %v689_v11, %v237_v13 }
 0x533   :  { %v239_v15 = vadd.f32 %v689_v11, %v238_v14 }
 0x535   :  { %v243_v18 = vsel %vm242_vm15, %v689_v11, %v239_v15 }
 0x536   :  { %v248_v21 = vsel %vm245_vm0, %v247_v19, %v243_v18 }
 0x537   :  { %v251_v23 = vmul.f32 %v248_v21, %v194_v62 }
 0x594   :  { %v254_v20 = vpop.permute.xlu0 %253 }
 0x595   :  { %v256_v22 = vmul.f32 %v254_v20, %v248_v21 }
 0x597   :  { %258 = vrot.lane.b32.xlu1 %v256_v22, %s759_s2 }
 0x609   :  { %v259_v24 = vpop.permute.xlu1 %258 }
 0x60a   :  { %v261_v25 = vadd.f32 %v259_v24, %v251_v23 }
 0x60c   :  { %690 = vtanh.f32 %v261_v25 }
 0x612   :  { %v691_v26 = vpop.eup %690 }
 0x613   :  { %264 = vrot.lane.b32.xlu2 %v691_v26, %s759_s2 }
 0x66d   :  { %v265_v27 = vpop.permute.xlu2 %264 }
 0x66e   :  { %v267_v28 = vmul.f32 %v265_v27, %v248_v21  ;;  %v408_v21 = vld [vmem:[#allocation2 + $0xa] sm:$0x3] }
 0x670   :  { %269 = vrot.lane.b32.xlu0 %v267_v28, %s760_s1 }
 0x6e2   :  { %v270_v29 = vpop.permute.xlu0 %269 }
 0x6e3   :  { %273 = vst.msk [vmem:[#allocation3 + $0x4] sm:$0x3] %vm138_vm8, %v270_v29  ;;  %646 = vmatmul.msk.f32.vlgmr.msrb.gmra.mxu1 %vm64_vm1, %v270_v29 }
 0x760   :  { %v294_v31 = vpop.f32.mrf.mxu1 }
 0x761   :  { %v297_v32 = vadd.f32 %v294_v31, %v274_v30 }
 0x763   :  { %692 = vtanh.f32 %v297_v32  ;;  %v647_v34 = vmul.f32 -1.442695, %v297_v32 }
 0x765   :  { %694 = vpow2.f32 %v647_v34 }
 0x769   :  { %v693_v33 = vpop.eup %692 }
 0x76a   :  { %320 = vrot.lane.b32.xlu1 %v693_v33, %s758_s7 }
 0x76b   :  { %v695_v35 = vpop.eup %694 }
 0x76c   :  { %v301_v36 = vadd.f32 1.0, %v695_v35 }
 0x76e   :  { %696 = vrcp.f32 %v301_v36  ;;  %v313_v42 = vand.u32 2147483648, %v301_v36  ;;  %vm307_vm5 = vweird.f32 %v301_v36  ;;  %v311_v43 = vand.u32 2147483647, %v301_v36 }
 0x770   :  { %v314_v45 = vor.u32 1.1754944e-38, %v313_v42  ;;  %vm312_vm7 = vcmp.eq.f32.partialorder %v311_v43, 8.507059e+37 }
 0x774   :  { %v697_v37 = vpop.eup %696 }
 0x775   :  { %v303_v38 = vmul.f32 %v697_v37, %v301_v36  ;;  %vm308_vm4 = vweird.f32 %v697_v37 }
 0x776   :  { %vm309_vm6 = vmor %vm307_vm5, %vm308_vm4 }
 0x777   :  { %v304_v39 = vsub.f32 1.0, %v303_v38 }
 0x779   :  { %v305_v40 = vmul.f32 %v697_v37, %v304_v39 }
 0x77b   :  { %v306_v41 = vadd.f32 %v697_v37, %v305_v40 }
 0x77d   :  { %v310_v44 = vsel %vm309_vm6, %v697_v37, %v306_v41 }
 0x77e   :  { %v315_v47 = vsel %vm312_vm7, %v314_v45, %v310_v44 }
 0x77f   :  { %v318_v49 = vmul.f32 %v315_v47, %v261_v25 }
 0x7dc   :  { %v321_v46 = vpop.permute.xlu1 %320 }
 0x7dd   :  { %v323_v48 = vmul.f32 %v321_v46, %v315_v47 }
 0x7df   :  { %325 = vrot.lane.b32.xlu2 %v323_v48, %s759_s2 }
 0x839   :  { %v326_v50 = vpop.permute.xlu2 %325 }
 0x83a   :  { %v328_v51 = vadd.f32 %v326_v50, %v318_v49 }
 0x83c   :  { %698 = vtanh.f32 %v328_v51 }
 0x842   :  { %v699_v52 = vpop.eup %698 }
 0x843   :  { %331 = vrot.lane.b32.xlu0 %v699_v52, %s759_s2 }
 0x8b5   :  { %v332_v54 = vpop.permute.xlu0 %331 }
 0x8b6   :  { %v334_v55 = vmul.f32 %v332_v54, %v315_v47  ;;  %v475_v47 = vld [vmem:[#allocation2 + $0xc] sm:$0x3] }
 0x8b8   :  { %336 = vrot.lane.b32.xlu1 %v334_v55, %s760_s1 }
 0x92a   :  { %v337_v58 = vpop.permute.xlu1 %336 }
 0x92b   :  { %340 = vst.msk [vmem:[#allocation3 + $0x6] sm:$0x3] %vm138_vm8, %v337_v58  ;;  %649 = vmatmul.msk.f32.vlgmr.msrb.gmra.mxu2 %vm64_vm1, %v337_v58 }
 0x9ae   :  { %v361_v60 = vpop.f32.mrf.mxu2 }
 0x9af   :  { %v364_v61 = vadd.f32 %v361_v60, %v341_v59 }
 0x9b1   :  { %700 = vtanh.f32 %v364_v61  ;;  %v650_v63 = vmul.f32 -1.442695, %v364_v61 }
 0x9b3   :  { %702 = vpow2.f32 %v650_v63 }
 0x9b7   :  { %v701_v62 = vpop.eup %700 }
 0x9b8   :  { %387 = vrot.lane.b32.xlu2 %v701_v62, %s758_s7 }
 0x9b9   :  { %v703_v0 = vpop.eup %702 }
 0x9ba   :  { %v368_v1 = vadd.f32 1.0, %v703_v0 }
 0x9bc   :  { %704 = vrcp.f32 %v368_v1  ;;  %v380_v6 = vand.u32 2147483648, %v368_v1  ;;  %vm374_vm3 = vweird.f32 %v368_v1  ;;  %v378_v7 = vand.u32 2147483647, %v368_v1 }
 0x9be   :  { %v381_v9 = vor.u32 1.1754944e-38, %v380_v6  ;;  %vm379_vm10 = vcmp.eq.f32.partialorder %v378_v7, 8.507059e+37 }
 0x9c2   :  { %v705_v10 = vpop.eup %704 }
 0x9c3   :  { %v370_v2 = vmul.f32 %v705_v10, %v368_v1  ;;  %vm375_vm2 = vweird.f32 %v705_v10 }
 0x9c4   :  { %vm376_vm9 = vmor %vm374_vm3, %vm375_vm2 }
 0x9c5   :  { %v371_v3 = vsub.f32 1.0, %v370_v2 }
 0x9c7   :  { %v372_v4 = vmul.f32 %v705_v10, %v371_v3 }
 0x9c9   :  { %v373_v5 = vadd.f32 %v705_v10, %v372_v4 }
 0x9cb   :  { %v377_v8 = vsel %vm376_vm9, %v705_v10, %v373_v5 }
 0x9cc   :  { %v382_v12 = vsel %vm379_vm10, %v381_v9, %v377_v8  ;;  %v542_v8 = vld [vmem:[#allocation2 + $0xe] sm:$0x3] }
 0x9cd   :  { %v385_v14 = vmul.f32 %v382_v12, %v328_v51 }
 0xa12   :  { %v388_v11 = vpop.permute.xlu2 %387 }
 0xa13   :  { %v390_v13 = vmul.f32 %v388_v11, %v382_v12 }
 0xa15   :  { %392 = vrot.lane.b32.xlu0 %v390_v13, %s759_s2 }
 0xa87   :  { %v393_v15 = vpop.permute.xlu0 %392 }
 0xa88   :  { %v395_v16 = vadd.f32 %v393_v15, %v385_v14 }
 0xa8a   :  { %706 = vtanh.f32 %v395_v16 }
 0xa90   :  { %v707_v17 = vpop.eup %706 }
 0xa91   :  { %398 = vrot.lane.b32.xlu1 %v707_v17, %s759_s2 }
 0xb03   :  { %v399_v18 = vpop.permute.xlu1 %398 }
 0xb04   :  { %v401_v19 = vmul.f32 %v399_v18, %v382_v12 }
 0xb06   :  { %403 = vrot.lane.b32.xlu2 %v401_v19, %s760_s1 }
 0xb60   :  { %v404_v20 = vpop.permute.xlu2 %403 }
 0xb61   :  { %407 = vst.msk [vmem:[#allocation3 + $0x8] sm:$0x3] %vm138_vm8, %v404_v20  ;;  %652 = vmatmul.msk.f32.vlgmr.msrb.gmra.mxu3 %vm64_vm1, %v404_v20 }
 0xbe4   :  { %v428_v22 = vpop.f32.mrf.mxu3 }
 0xbe5   :  { %v431_v23 = vadd.f32 %v428_v22, %v408_v21 }
 0xbe7   :  { %708 = vtanh.f32 %v431_v23  ;;  %v653_v25 = vmul.f32 -1.442695, %v431_v23 }
 0xbe9   :  { %710 = vpow2.f32 %v653_v25 }
 0xbed   :  { %v709_v24 = vpop.eup %708 }
 0xbee   :  { %454 = vrot.lane.b32.xlu0 %v709_v24, %s758_s7 }
 0xbef   :  { %v711_v26 = vpop.eup %710 }
 0xbf0   :  { %v435_v27 = vadd.f32 1.0, %v711_v26 }
 0xbf2   :  { %712 = vrcp.f32 %v435_v27  ;;  %v447_v33 = vand.u32 2147483648, %v435_v27  ;;  %vm441_vm12 = vweird.f32 %v435_v27  ;;  %v445_v34 = vand.u32 2147483647, %v435_v27 }
 0xbf4   :  { %v448_v36 = vor.u32 1.1754944e-38, %v447_v33  ;;  %vm446_vm14 = vcmp.eq.f32.partialorder %v445_v34, 8.507059e+37 }
 0xbf8   :  { %v713_v28 = vpop.eup %712 }
 0xbf9   :  { %v437_v29 = vmul.f32 %v713_v28, %v435_v27  ;;  %vm442_vm11 = vweird.f32 %v713_v28 }
 0xbfa   :  { %vm443_vm13 = vmor %vm441_vm12, %vm442_vm11 }
 0xbfb   :  { %v438_v30 = vsub.f32 1.0, %v437_v29 }
 0xbfd   :  { %v439_v31 = vmul.f32 %v713_v28, %v438_v30 }
 0xbff   :  { %v440_v32 = vadd.f32 %v713_v28, %v439_v31 }
 0xc01   :  { %v444_v35 = vsel %vm443_vm13, %v713_v28, %v440_v32 }
 0xc02   :  { %v449_v38 = vsel %vm446_vm14, %v448_v36, %v444_v35 }
 0xc03   :  { %v452_v40 = vmul.f32 %v449_v38, %v395_v16 }
 0xc60   :  { %v455_v37 = vpop.permute.xlu0 %454 }
 0xc61   :  { %v457_v39 = vmul.f32 %v455_v37, %v449_v38 }
 0xc63   :  { %459 = vrot.lane.b32.xlu1 %v457_v39, %s759_s2 }
 0xcd5   :  { %v460_v41 = vpop.permute.xlu1 %459 }
 0xcd6   :  { %v462_v42 = vadd.f32 %v460_v41, %v452_v40 }
 0xcd8   :  { %714 = vtanh.f32 %v462_v42 }
 0xcde   :  { %v715_v43 = vpop.eup %714 }
 0xcdf   :  { %465 = vrot.lane.b32.xlu2 %v715_v43, %s759_s2 }
 0xd39   :  { %v466_v44 = vpop.permute.xlu2 %465 }
 0xd3a   :  { %v468_v45 = vmul.f32 %v466_v44, %v449_v38 }
 0xd3c   :  { %470 = vrot.lane.b32.xlu0 %v468_v45, %s760_s1 }
 0xdae   :  { %v471_v46 = vpop.permute.xlu0 %470 }
 0xdaf   :  { %474 = vst.msk [vmem:[#allocation3 + $0xa] sm:$0x3] %vm138_vm8, %v471_v46  ;;  %655 = vmatmul.msk.f32.vlgmr.msra.gmra.mxu1 %vm64_vm1, %v471_v46 }
 0xe2c   :  { %v495_v48 = vpop.f32.mrf.mxu1 }
 0xe2d   :  { %v498_v49 = vadd.f32 %v495_v48, %v475_v47 }
 0xe2f   :  { %716 = vtanh.f32 %v498_v49  ;;  %v656_v51 = vmul.f32 -1.442695, %v498_v49 }
 0xe31   :  { %718 = vpow2.f32 %v656_v51 }
 0xe35   :  { %v717_v50 = vpop.eup %716 }
 0xe36   :  { %521 = vrot.lane.b32.xlu1 %v717_v50, %s758_s7 }
 0xe37   :  { %v719_v52 = vpop.eup %718 }
 0xe38   :  { %v502_v53 = vadd.f32 1.0, %v719_v52 }
 0xe3a   :  { %720 = vrcp.f32 %v502_v53  ;;  %v514_v59 = vand.u32 2147483648, %v502_v53  ;;  %vm508_vm0 = vweird.f32 %v502_v53  ;;  %v512_v60 = vand.u32 2147483647, %v502_v53 }
 0xe3c   :  { %v515_v62 = vor.u32 1.1754944e-38, %v514_v59  ;;  %vm513_vm5 = vcmp.eq.f32.partialorder %v512_v60, 8.507059e+37 }
 0xe40   :  { %v721_v54 = vpop.eup %720 }
 0xe41   :  { %v504_v55 = vmul.f32 %v721_v54, %v502_v53  ;;  %vm509_vm15 = vweird.f32 %v721_v54 }
 0xe42   :  { %vm510_vm4 = vmor %vm508_vm0, %vm509_vm15 }
 0xe43   :  { %v505_v56 = vsub.f32 1.0, %v504_v55 }
 0xe45   :  { %v506_v57 = vmul.f32 %v721_v54, %v505_v56 }
 0xe47   :  { %v507_v58 = vadd.f32 %v721_v54, %v506_v57 }
 0xe49   :  { %v511_v61 = vsel %vm510_vm4, %v721_v54, %v507_v58 }
 0xe4a   :  { %v516_v0 = vsel %vm513_vm5, %v515_v62, %v511_v61 }
 0xe4b   :  { %v519_v10 = vmul.f32 %v516_v0, %v462_v42 }
 0xea8   :  { %v522_v63 = vpop.permute.xlu1 %521 }
 0xea9   :  { %v524_v1 = vmul.f32 %v522_v63, %v516_v0 }
 0xeab   :  { %526 = vrot.lane.b32.xlu2 %v524_v1, %s759_s2 }
 0xf05   :  { %v527_v2 = vpop.permute.xlu2 %526 }
 0xf06   :  { %v529_v3 = vadd.f32 %v527_v2, %v519_v10 }
 0xf08   :  { %722 = vtanh.f32 %v529_v3 }
 0xf0e   :  { %v723_v4 = vpop.eup %722 }
 0xf0f   :  { %532 = vrot.lane.b32.xlu0 %v723_v4, %s759_s2 }
 0xf81   :  { %v533_v5 = vpop.permute.xlu0 %532 }
 0xf82   :  { %v535_v6 = vmul.f32 %v533_v5, %v516_v0 }
 0xf84   :  { %537 = vrot.lane.b32.xlu1 %v535_v6, %s760_s1 }
 0xff6   :  { %v538_v7 = vpop.permute.xlu1 %537 }
 0xff7   :  { %541 = vst.msk [vmem:[#allocation3 + $0xc] sm:$0x3] %vm138_vm8, %v538_v7  ;;  %658 = vmatmul.msk.f32.vlgmr.msra.gmra.mxu2 %vm64_vm1, %v538_v7 }
0x107a   :  { %v562_v9 = vpop.f32.mrf.mxu2 }
0x107b   :  { %v565_v11 = vadd.f32 %v562_v9, %v542_v8 }
0x107d   :  { %724 = vtanh.f32 %v565_v11  ;;  %v659_v13 = vmul.f32 -1.442695, %v565_v11 }
0x107f   :  { %726 = vpow2.f32 %v659_v13 }
0x1083   :  { %v725_v12 = vpop.eup %724 }
0x1084   :  { %588 = vrot.lane.b32.xlu2 %v725_v12, %s758_s7 }
0x1085   :  { %v727_v14 = vpop.eup %726 }
0x1086   :  { %v569_v15 = vadd.f32 1.0, %v727_v14 }
0x1088   :  { %728 = vrcp.f32 %v569_v15  ;;  %v581_v21 = vand.u32 2147483648, %v569_v15  ;;  %vm575_vm1 = vweird.f32 %v569_v15  ;;  %v579_v22 = vand.u32 2147483647, %v569_v15 }
0x108a   :  { %v582_v24 = vor.u32 1.1754944e-38, %v581_v21  ;;  %vm580_vm2 = vcmp.eq.f32.partialorder %v579_v22, 8.507059e+37 }
0x108e   :  { %v729_v16 = vpop.eup %728 }
0x108f   :  { %v571_v17 = vmul.f32 %v729_v16, %v569_v15  ;;  %vm576_vm6 = vweird.f32 %v729_v16 }
0x1090   :  { %vm577_vm7 = vmor %vm575_vm1, %vm576_vm6 }
0x1091   :  { %v572_v18 = vsub.f32 1.0, %v571_v17 }
0x1093   :  { %v573_v19 = vmul.f32 %v729_v16, %v572_v18 }
0x1095   :  { %v574_v20 = vadd.f32 %v729_v16, %v573_v19 }
0x1097   :  { %v578_v23 = vsel %vm577_vm7, %v729_v16, %v574_v20 }
0x1098   :  { %v583_v26 = vsel %vm580_vm2, %v582_v24, %v578_v23 }
0x1099   :  { %v586_v28 = vmul.f32 %v583_v26, %v529_v3 }
0x10de   :  { %v589_v25 = vpop.permute.xlu2 %588 }
0x10df   :  { %v591_v27 = vmul.f32 %v589_v25, %v583_v26 }
0x10e1   :  { %593 = vrot.lane.b32.xlu0 %v591_v27, %s759_s2 }
0x1153   :  { %v594_v29 = vpop.permute.xlu0 %593 }
0x1154   :  { %v596_v30 = vadd.f32 %v594_v29, %v586_v28 }
0x1156   :  { %730 = vtanh.f32 %v596_v30  ;;  %610 = vrot.lane.b32.xlu0 %v596_v30, %s761_s0 }
0x115c   :  { %v731_v31 = vpop.eup %730 }
0x115d   :  { %599 = vrot.lane.b32.xlu1 %v731_v31, %s759_s2 }
0x11c8   :  { %v611_v32 = vpop.permute.xlu0 %610 }
0x11c9   :  { %614 = vst.msk [vmem:[#allocation3 + $0x10] sm:$0x3] %vm138_vm8, %v611_v32 }
0x11cf   :  { %v600_v33 = vpop.permute.xlu1 %599 }
0x11d0   :  { %v602_v34 = vmul.f32 %v600_v33, %v583_v26 }
0x11d2   :  { %604 = vrot.lane.b32.xlu2 %v602_v34, %s760_s1 }
0x122c   :  { %v605_v35 = vpop.permute.xlu2 %604 }
0x122d   :  { %608 = vst.msk [vmem:[#allocation3 + $0xe] sm:$0x3] %vm138_vm8, %v605_v35 }
0x122e   :  { %627 = dma.vmem_to_hbm [thread:$0]  %s620_s13, 288, %s622_s16, [#allocation4], %s763_s17, %s763_s17, %s764_s18  }
0x122f   :  { %756 = dma.done.wait [#allocation4], 288  }
0x1230   :  { %757 = vsyncadd [#allocation4], 4294967008 }
0x1231   :  { %632 = vsyncpa [#allocation4], 1 }

</bundles_post_ra>
